<compile_context>
chip_gen: v5e
topology: v5e:2x2
jax: 0.10.0
libtpu: 0.0.40
codegen_flags: <defaults>
</compile_context>

<pallas_src>
import jax
import jax.numpy as jnp
from jax.experimental import pallas as pl
from jax.experimental.pallas import tpu as pltpu


def _conv1x1_bn_relu_kernel(x1_ref, x2_ref, wa_ref, wb_ref, bias_ref, o_ref):
    # x1_ref/x2_ref: (1, C_half, hwt) f32 tiles of the two image features;
    #                cast to bf16 in VMEM (no separate HBM cast pass).
    # wa_ref/wb_ref: (c_tile, C_half) bf16, BN scale already folded in.
    # bias_ref:      (c_tile, 1) f32, folded BN bias (includes conv bias).
    # o_ref:         (1, c_tile, hwt) bf16.
    x1 = x1_ref[0].astype(jnp.bfloat16)
    x2 = x2_ref[0].astype(jnp.bfloat16)
    y = jnp.dot(wa_ref[...], x1, preferred_element_type=jnp.float32)
    y = y + jnp.dot(wb_ref[...], x2, preferred_element_type=jnp.float32)
    y = y + bias_ref[...]                        # f32 epilogue (v5e has no bf16 VPU)
    o_ref[0] = jnp.maximum(y, 0.0).astype(o_ref.dtype)


def _vmem_limit_bytes(c_half, c_tile, hwt, n_c_blocks):
    """Scoped-VMEM limit: actual working set + headroom, capped under v7x's
    64 MiB physical VMEM (v5e/v6e have 128 MiB so the cap is always safe)."""
    in_tile = c_half * hwt * 4            # f32 activation tile
    out_tile = c_tile * hwt * 2           # bf16 output tile
    w_tile = c_tile * c_half * 2          # bf16 folded half-weight
    bias_tile = c_tile * 128 * 4          # lane-padded f32 bias
    w_bufs = 1 if n_c_blocks == 1 else 2  # single-buffered when grid-constant
    est = (2 * 2 * in_tile                # x1, x2 double-buffered
           + 2 * out_tile                 # output double-buffered
           + w_bufs * (2 * w_tile + bias_tile))
    return int(min(max(est * 3 // 2 + (4 << 20), 32 << 20), 56 << 20))


def conv_bn_relu_pair(x1_nchw, x2_nchw, w, b, gamma, beta, run_mean, run_var,
                      eps=1e-5, hw_tile=1024):
    """Pallas equivalent of Conv(2*C_half, C_out) applied to cat([x1, x2], dim=1)
    in eval mode, without materializing the concatenation.

    hw_tile: spatial (lane) tile. 1024 is safe on all gens; v6e (128 MiB VMEM)
    can use 2048, v7x (64 MiB) should stay <= 1024.
    """
    N, C_half, H, W = x1_nchw.shape
    C_out, C_in = w.shape
    assert C_in == 2 * C_half
    HW = H * W

    # Fold BN (eval mode) into the weight / bias.
    inv_std = 1.0 / jnp.sqrt(run_var + eps)
    scale = gamma * inv_std                                   # (C_out,)
    w_folded = (w * scale[:, None]).astype(jnp.bfloat16)      # (C_out, C_in)
    wa = w_folded[:, :C_half]
    wb = w_folded[:, C_half:]
    bias = (scale * (b - run_mean) + beta).reshape(C_out, 1).astype(jnp.float32)

    # NCHW with spatial flattened to the lane dim; reshape is free, and the
    # f32 activations are consumed directly (cast to bf16 inside the kernel).
    x1 = x1_nchw.reshape(N, C_half, HW).astype(jnp.float32)
    x2 = x2_nchw.reshape(N, C_half, HW).astype(jnp.float32)

    # Spatial tile: multiple of 128 lanes when tiled, full extent otherwise.
    hwt = HW if HW <= hw_tile else hw_tile
    n_j = pl.cdiv(HW, hwt)

    # Optional C_out split: only when there is almost no (N, spatial) grid
    # parallelism (small pyramid levels) so a second TensorCore (v7x) gets
    # work. 128-multiples only, so tile constraints stay clean; harmless on
    # single-core v5e/v6e.
    c_tile = C_out
    if N * n_j < 4 and C_out >= 256 and C_out % 128 == 0:
        c_tile = max(128, (C_out // 2) // 128 * 128)
    n_c = pl.cdiv(C_out, c_tile)

    grid = (N, n_j, n_c)  # C_out innermost: activation tiles reused across it
    vmem_limit = _vmem_limit_bytes(C_half, c_tile, hwt, n_c)

    cost = pl.CostEstimate(
        flops=2 * C_in * C_out * HW * N,
        transcendentals=0,
        bytes_accessed=(2 * N * C_half * HW * 4      # two f32 inputs
                        + C_out * C_in * 2           # bf16 folded weight
                        + C_out * 4                  # bias
                        + N * C_out * HW * 2),       # bf16 output
    )

    def _run(weight_pipeline_mode):
        wkw = ({} if weight_pipeline_mode is None
               else dict(pipeline_mode=weight_pipeline_mode))
        return pl.pallas_call(
            _conv1x1_bn_relu_kernel,
            out_shape=jax.ShapeDtypeStruct((N, C_out, HW), jnp.bfloat16),
            grid=grid,
            in_specs=[
                pl.BlockSpec((1, C_half, hwt), lambda n, j, c: (n, 0, j)),
                pl.BlockSpec((1, C_half, hwt), lambda n, j, c: (n, 0, j)),
                pl.BlockSpec((c_tile, C_half), lambda n, j, c: (c, 0), **wkw),
                pl.BlockSpec((c_tile, C_half), lambda n, j, c: (c, 0), **wkw),
                pl.BlockSpec((c_tile, 1), lambda n, j, c: (c, 0), **wkw),
            ],
            out_specs=pl.BlockSpec((1, c_tile, hwt), lambda n, j, c: (n, c, j)),
            compiler_params=pltpu.CompilerParams(
                dimension_semantics=("parallel", "parallel", "parallel"),
                vmem_limit_bytes=vmem_limit),
            cost_estimate=cost,
        )(x1, x2, wa, wb, bias)

    if n_c == 1:
        # Weights/bias are grid-constant: single-buffer them to reclaim VMEM.
        try:
            out = _run(pl.Buffered(1))
        except Exception:
            # Older jax without pipeline_mode support on TPU pallas_call.
            out = _run(None)
    else:
        out = _run(None)

    return out.reshape(N, C_out, H, W)


def _ref_conv_bn_relu_pair(x1, x2, w, b, gamma, beta, run_mean, run_var,
                           eps=1e-5):
    """Plain-JAX reference (same bf16 rounding of inputs/folded weight)."""
    N, C_half, H, W = x1.shape
    C_out = w.shape[0]
    inv_std = 1.0 / jnp.sqrt(run_var + eps)
    scale = gamma * inv_std
    w_folded = (w * scale[:, None]).astype(jnp.bfloat16).astype(jnp.float32)
    bias = scale * (b - run_mean) + beta
    x = jnp.concatenate([x1, x2], axis=1).astype(jnp.bfloat16).astype(jnp.float32)
    x2d = x.reshape(N, 2 * C_half, H * W)
    y = jnp.einsum("oc,nch->noh", w_folded, x2d,
                   preferred_element_type=jnp.float32)
    y = y + bias[None, :, None]
    y = jnp.maximum(y, 0.0)
    return y.reshape(N, C_out, H, W)


def init_conv_params(key, c_in, c_out):
    kw, kb, kg, kbe, km, kv = jax.random.split(key, 6)
    return dict(
        w=jax.random.normal(kw, (c_out, c_in), jnp.float32) * 0.02,
        b=jax.random.normal(kb, (c_out,), jnp.float32) * 0.01,
        gamma=1.0 + 0.1 * jax.random.normal(kg, (c_out,), jnp.float32),
        beta=0.1 * jax.random.normal(kbe, (c_out,), jnp.float32),
        run_mean=0.1 * jax.random.normal(km, (c_out,), jnp.float32),
        run_var=jnp.abs(jax.random.normal(kv, (c_out,), jnp.float32)) + 0.5,
    )


def vista_down_forward(vis1, vis2, params):
    """Translatable portion of VisTA.forward: the down1/down2/down3 path.
    The channel-concatenate is fused into the kernel (split-weight matmul)."""
    outs = []
    for lvl, p in enumerate(params):
        outs.append(conv_bn_relu_pair(
            vis1[lvl], vis2[lvl], p["w"], p["b"], p["gamma"], p["beta"],
            p["run_mean"], p["run_var"]))
    return outs


if __name__ == "__main__":
    key = jax.random.PRNGKey(0)
    N = 2
    # Small synthetic multi-scale features standing in for the (unavailable)
    # CLIP-RN101 backbone outputs. Real model: per-image channels
    # (512, 1024, 512) -> down convs 1024->512, 2048->1024, 1024->512.
    # Scaled-down version here; the last level is shaped so the C_out-split
    # grid path (v7x small-level parallelism) is exercised.
    level_cfg = [
        # (per-image channels, H, W)  -> conv in = 2*c, out = c
        (64, 16, 16),   # down1
        (128, 8, 8),    # down2
        (256, 4, 4),    # down3 (small spatial -> C_out split kicks in)
    ]

    keys = jax.random.split(key, 3 * len(level_cfg))
    vis1, vis2, params = [], [], []
    for i, (c, h, w) in enumerate(level_cfg):
        vis1.append(jax.random.normal(keys[3 * i + 0], (N, c, h, w), jnp.float32))
        vis2.append(jax.random.normal(keys[3 * i + 1], (N, c, h, w), jnp.float32))
        params.append(init_conv_params(keys[3 * i + 2], 2 * c, c))

    outs = vista_down_forward(vis1, vis2, params)
    outs = [jax.block_until_ready(o) for o in outs]

    # Verify against plain-JAX reference (kernel output is bf16).
    for lvl, p in enumerate(params):
        ref = _ref_conv_bn_relu_pair(
            vis1[lvl], vis2[lvl], p["w"], p["b"], p["gamma"], p["beta"],
            p["run_mean"], p["run_var"])
        got = outs[lvl].astype(jnp.float32)
        assert got.shape == ref.shape
        assert outs[lvl].dtype == jnp.bfloat16
        assert jnp.allclose(got, ref, atol=2e-2, rtol=2e-2), (
            f"level {lvl} mismatch: max abs err "
            f"{jnp.max(jnp.abs(got - ref))}")

    print("KERNEL_OK")
</pallas_src>

<mosaic_0001>
module attributes {stable_mosaic.version = 11 : i64} {
  func.func @_conv1x1_bn_relu_kernel(%arg0: i32, %arg1: i32, %arg2: i32, %arg3: memref<1x64x256xf32, #tpu.memory_space<vmem>>, %arg4: memref<1x64x256xf32, #tpu.memory_space<vmem>>, %arg5: memref<64x64xbf16, #tpu.memory_space<vmem>>, %arg6: memref<64x64xbf16, #tpu.memory_space<vmem>>, %arg7: memref<64x1xf32, #tpu.memory_space<vmem>>, %arg8: memref<1x64x256xbf16, #tpu.memory_space<vmem>>) attributes {dimension_semantics = [#tpu.dimension_semantics<parallel>, #tpu.dimension_semantics<parallel>, #tpu.dimension_semantics<parallel>], iteration_bounds = array<i64: 2, 1, 1>, scalar_prefetch = 0 : i64, scratch_operands = 0 : i64, tpu.core_type = #tpu.core_type<tc>, window_params = [{transform_indices = @transform_0, window_bounds = array<i64: 1, 64, 256>}, {transform_indices = @transform_1, window_bounds = array<i64: 1, 64, 256>}, {pipeline_mode = #tpu.pipeline_mode<synchronous>, transform_indices = @transform_2, window_bounds = array<i64: 64, 64>}, {pipeline_mode = #tpu.pipeline_mode<synchronous>, transform_indices = @transform_3, window_bounds = array<i64: 64, 64>}, {pipeline_mode = #tpu.pipeline_mode<synchronous>, transform_indices = @transform_4, window_bounds = array<i64: 64, 1>}, {transform_indices = @transform_5, window_bounds = array<i64: 1, 64, 256>}]} {
    %c0 = arith.constant 0 : index
    %c0_0 = arith.constant 0 : index
    %c0_1 = arith.constant 0 : index
    %0 = vector.load %arg3[%c0, %c0_0, %c0_1] : memref<1x64x256xf32, #tpu.memory_space<vmem>>, vector<1x64x256xf32>
    %1 = vector.shape_cast %0 : vector<1x64x256xf32> to vector<64x256xf32>
    %2 = arith.truncf %1 : vector<64x256xf32> to vector<64x256xbf16>
    %c0_2 = arith.constant 0 : index
    %c0_3 = arith.constant 0 : index
    %c0_4 = arith.constant 0 : index
    %3 = vector.load %arg4[%c0_2, %c0_3, %c0_4] : memref<1x64x256xf32, #tpu.memory_space<vmem>>, vector<1x64x256xf32>
    %4 = vector.shape_cast %3 : vector<1x64x256xf32> to vector<64x256xf32>
    %5 = arith.truncf %4 : vector<64x256xf32> to vector<64x256xbf16>
    %c0_5 = arith.constant 0 : index
    %c0_6 = arith.constant 0 : index
    %6 = vector.load %arg5[%c0_5, %c0_6] : memref<64x64xbf16, #tpu.memory_space<vmem>>, vector<64x64xbf16>
    %cst = arith.constant dense<0.000000e+00> : vector<64x256xf32>
    %7 = tpu.matmul %6, %2, %cst {dimension_numbers = #tpu.dot_dimension_numbers<[1], [0], [0], [1], [0, 0, 1, 1], [], []>} : vector<64x64xbf16>, vector<64x256xbf16>, vector<64x256xf32> -> vector<64x256xf32>
    %c0_7 = arith.constant 0 : index
    %c0_8 = arith.constant 0 : index
    %8 = vector.load %arg6[%c0_7, %c0_8] : memref<64x64xbf16, #tpu.memory_space<vmem>>, vector<64x64xbf16>
    %cst_9 = arith.constant dense<0.000000e+00> : vector<64x256xf32>
    %9 = tpu.matmul %8, %5, %cst_9 {dimension_numbers = #tpu.dot_dimension_numbers<[1], [0], [0], [1], [0, 0, 1, 1], [], []>} : vector<64x64xbf16>, vector<64x256xbf16>, vector<64x256xf32> -> vector<64x256xf32>
    %10 = arith.addf %7, %9 : vector<64x256xf32>
    %c0_10 = arith.constant 0 : index
    %c0_11 = arith.constant 0 : index
    %11 = vector.load %arg7[%c0_10, %c0_11] : memref<64x1xf32, #tpu.memory_space<vmem>>, vector<64x1xf32>
    %12 = vector.broadcast %11 : vector<64x1xf32> to vector<64x256xf32>
    %13 = arith.addf %10, %12 : vector<64x256xf32>
    %cst_12 = arith.constant 0.000000e+00 : f32
    %14 = vector.broadcast %cst_12 : f32 to vector<64x256xf32>
    %15 = arith.maximumf %13, %14 : vector<64x256xf32>
    %16 = arith.truncf %15 : vector<64x256xf32> to vector<64x256xbf16>
    %c0_13 = arith.constant 0 : index
    %c0_14 = arith.constant 0 : index
    %c0_15 = arith.constant 0 : index
    %17 = vector.load %arg8[%c0_13, %c0_14, %c0_15] : memref<1x64x256xbf16, #tpu.memory_space<vmem>>, vector<1x64x256xbf16>
    %18 = vector.shape_cast %17 : vector<1x64x256xbf16> to vector<64x256xbf16>
    %19 = vector.shape_cast %16 : vector<64x256xbf16> to vector<1x64x256xbf16>
    tpu.vector_store %arg8[%c0_13, %c0_14, %c0_15], %19 {strides = array<i32>} : memref<1x64x256xbf16, #tpu.memory_space<vmem>>, vector<1x64x256xbf16>,
    return
  }
  func.func @transform_0(%arg0: i32, %arg1: i32, %arg2: i32) -> (i32, i32, i32) {
    %c0_i32 = arith.constant 0 : i32
    %c0_i32_0 = arith.constant 0 : i32
    return %arg0, %c0_i32, %arg1 : i32, i32, i32
  }
  func.func @transform_1(%arg0: i32, %arg1: i32, %arg2: i32) -> (i32, i32, i32) {
    %c0_i32 = arith.constant 0 : i32
    %c0_i32_0 = arith.constant 0 : i32
    return %arg0, %c0_i32, %arg1 : i32, i32, i32
  }
  func.func @transform_2(%arg0: i32, %arg1: i32, %arg2: i32) -> (i32, i32) {
    %c0_i32 = arith.constant 0 : i32
    %c0_i32_0 = arith.constant 0 : i32
    return %arg2, %c0_i32 : i32, i32
  }
  func.func @transform_3(%arg0: i32, %arg1: i32, %arg2: i32) -> (i32, i32) {
    %c0_i32 = arith.constant 0 : i32
    %c0_i32_0 = arith.constant 0 : i32
    return %arg2, %c0_i32 : i32, i32
  }
  func.func @transform_4(%arg0: i32, %arg1: i32, %arg2: i32) -> (i32, i32) {
    %c0_i32 = arith.constant 0 : i32
    %c0_i32_0 = arith.constant 0 : i32
    return %arg2, %c0_i32 : i32, i32
  }
  func.func @transform_5(%arg0: i32, %arg1: i32, %arg2: i32) -> (i32, i32, i32) {
    %c0_i32 = arith.constant 0 : i32
    return %arg0, %arg2, %arg1 : i32, i32, i32
  }
}

module attributes {stable_mosaic.version = 11 : i64} {
  func.func @_conv1x1_bn_relu_kernel(%arg0: i32, %arg1: i32, %arg2: i32, %arg3: memref<1x64x256xf32, #tpu.memory_space<vmem>>, %arg4: memref<1x64x256xf32, #tpu.memory_space<vmem>>, %arg5: memref<64x64xbf16, #tpu.memory_space<vmem>>, %arg6: memref<64x64xbf16, #tpu.memory_space<vmem>>, %arg7: memref<64x1xf32, #tpu.memory_space<vmem>>, %arg8: memref<1x64x256xbf16, #tpu.memory_space<vmem>>) attributes {dimension_semantics = [#tpu.dimension_semantics<parallel>, #tpu.dimension_semantics<parallel>, #tpu.dimension_semantics<parallel>], iteration_bounds = array<i64: 2, 1, 1>, scalar_prefetch = 0 : i64, scratch_operands = 0 : i64, tpu.core_type = #tpu.core_type<tc>, window_params = [{transform_indices = @transform_0, window_bounds = array<i64: 1, 64, 256>}, {transform_indices = @transform_1, window_bounds = array<i64: 1, 64, 256>}, {transform_indices = @transform_2, window_bounds = array<i64: 64, 64>}, {transform_indices = @transform_3, window_bounds = array<i64: 64, 64>}, {transform_indices = @transform_4, window_bounds = array<i64: 64, 1>}, {transform_indices = @transform_5, window_bounds = array<i64: 1, 64, 256>}]} {
    %c0 = arith.constant 0 : index
    %c0_0 = arith.constant 0 : index
    %c0_1 = arith.constant 0 : index
    %0 = vector.load %arg3[%c0, %c0_0, %c0_1] : memref<1x64x256xf32, #tpu.memory_space<vmem>>, vector<1x64x256xf32>
    %1 = vector.shape_cast %0 : vector<1x64x256xf32> to vector<64x256xf32>
    %2 = arith.truncf %1 : vector<64x256xf32> to vector<64x256xbf16>
    %c0_2 = arith.constant 0 : index
    %c0_3 = arith.constant 0 : index
    %c0_4 = arith.constant 0 : index
    %3 = vector.load %arg4[%c0_2, %c0_3, %c0_4] : memref<1x64x256xf32, #tpu.memory_space<vmem>>, vector<1x64x256xf32>
    %4 = vector.shape_cast %3 : vector<1x64x256xf32> to vector<64x256xf32>
    %5 = arith.truncf %4 : vector<64x256xf32> to vector<64x256xbf16>
    %c0_5 = arith.constant 0 : index
    %c0_6 = arith.constant 0 : index
    %6 = vector.load %arg5[%c0_5, %c0_6] : memref<64x64xbf16, #tpu.memory_space<vmem>>, vector<64x64xbf16>
    %cst = arith.constant dense<0.000000e+00> : vector<64x256xf32>
    %7 = tpu.matmul %6, %2, %cst {dimension_numbers = #tpu.dot_dimension_numbers<[1], [0], [0], [1], [0, 0, 1, 1], [], []>} : vector<64x64xbf16>, vector<64x256xbf16>, vector<64x256xf32> -> vector<64x256xf32>
    %c0_7 = arith.constant 0 : index
    %c0_8 = arith.constant 0 : index
    %8 = vector.load %arg6[%c0_7, %c0_8] : memref<64x64xbf16, #tpu.memory_space<vmem>>, vector<64x64xbf16>
    %cst_9 = arith.constant dense<0.000000e+00> : vector<64x256xf32>
    %9 = tpu.matmul %8, %5, %cst_9 {dimension_numbers = #tpu.dot_dimension_numbers<[1], [0], [0], [1], [0, 0, 1, 1], [], []>} : vector<64x64xbf16>, vector<64x256xbf16>, vector<64x256xf32> -> vector<64x256xf32>
    %10 = arith.addf %7, %9 : vector<64x256xf32>
    %c0_10 = arith.constant 0 : index
    %c0_11 = arith.constant 0 : index
    %11 = vector.load %arg7[%c0_10, %c0_11] : memref<64x1xf32, #tpu.memory_space<vmem>>, vector<64x1xf32>
    %12 = vector.broadcast %11 : vector<64x1xf32> to vector<64x256xf32>
    %13 = arith.addf %10, %12 : vector<64x256xf32>
    %cst_12 = arith.constant 0.000000e+00 : f32
    %14 = vector.broadcast %cst_12 : f32 to vector<64x256xf32>
    %15 = arith.maximumf %13, %14 : vector<64x256xf32>
    %16 = arith.truncf %15 : vector<64x256xf32> to vector<64x256xbf16>
    %c0_13 = arith.constant 0 : index
    %c0_14 = arith.constant 0 : index
    %c0_15 = arith.constant 0 : index
    %17 = vector.load %arg8[%c0_13, %c0_14, %c0_15] : memref<1x64x256xbf16, #tpu.memory_space<vmem>>, vector<1x64x256xbf16>
    %18 = vector.shape_cast %17 : vector<1x64x256xbf16> to vector<64x256xbf16>
    %19 = vector.shape_cast %16 : vector<64x256xbf16> to vector<1x64x256xbf16>
    tpu.vector_store %arg8[%c0_13, %c0_14, %c0_15], %19 {strides = array<i32>} : memref<1x64x256xbf16, #tpu.memory_space<vmem>>, vector<1x64x256xbf16>,
    return
  }
  func.func @transform_0(%arg0: i32, %arg1: i32, %arg2: i32) -> (i32, i32, i32) {
    %c0_i32 = arith.constant 0 : i32
    %c0_i32_0 = arith.constant 0 : i32
    return %arg0, %c0_i32, %arg1 : i32, i32, i32
  }
  func.func @transform_1(%arg0: i32, %arg1: i32, %arg2: i32) -> (i32, i32, i32) {
    %c0_i32 = arith.constant 0 : i32
    %c0_i32_0 = arith.constant 0 : i32
    return %arg0, %c0_i32, %arg1 : i32, i32, i32
  }
  func.func @transform_2(%arg0: i32, %arg1: i32, %arg2: i32) -> (i32, i32) {
    %c0_i32 = arith.constant 0 : i32
    %c0_i32_0 = arith.constant 0 : i32
    return %arg2, %c0_i32 : i32, i32
  }
  func.func @transform_3(%arg0: i32, %arg1: i32, %arg2: i32) -> (i32, i32) {
    %c0_i32 = arith.constant 0 : i32
    %c0_i32_0 = arith.constant 0 : i32
    return %arg2, %c0_i32 : i32, i32
  }
  func.func @transform_4(%arg0: i32, %arg1: i32, %arg2: i32) -> (i32, i32) {
    %c0_i32 = arith.constant 0 : i32
    %c0_i32_0 = arith.constant 0 : i32
    return %arg2, %c0_i32 : i32, i32
  }
  func.func @transform_5(%arg0: i32, %arg1: i32, %arg2: i32) -> (i32, i32, i32) {
    %c0_i32 = arith.constant 0 : i32
    return %arg0, %arg2, %arg1 : i32, i32, i32
  }
}

</mosaic_0001>

<bundles_post_ra>
// kernel: tpu_custom_call.1
= control target key start
LH: loop header
LB: loop body
LE: loop exit
PB: predicated region body
PF: predicated region fallthrough
CT: control target
= control target key end

     0   :  { %s1506_s0 = inlined_call_operand.hbm [shape: f32[2,64,256], index: 0, kind: input, shape index: {}]   ;;  %s1507_s1 = inlined_call_operand.hbm [shape: f32[2,64,256], index: 1, kind: input, shape index: {}]   ;;  %s1508_s2 = inlined_call_operand.vmem [shape: bf16[64,64], index: 2, kind: input, shape index: {}]   ;;  %s1509_s3 = inlined_call_operand.vmem [shape: bf16[64,64], index: 3, kind: input, shape index: {}]   ;;  %s1510_s4 = inlined_call_operand.vmem [shape: f32[64,1], index: 4, kind: input, shape index: {}]   ;;  %s1511_s5 = inlined_call_operand.hbm [shape: bf16[2,64,256], index: 5, kind: output, shape index: {}]  }
   0x1   :  { %1514 = sst [smem:[#allocation13_spill]] %s1506_s0 }
   0x2   :  { %10 = vsyncpa [#allocation3], 0 }
   0x3   :  { %12 = vsyncpa [#allocation3 + $0x1], 0 }
   0x4   :  { %13 = vsyncpa [#allocation6], 0 }
   0x5   :  { %15 = vsyncpa [#allocation6 + $0x1], 0 }
   0x6   :  { %16 = vsyncpa [#allocation4], 0 }
   0x7   :  { %18 = vsyncpa [#allocation4 + $0x1], 0  ;;  %s1253_s18 = smov 0   ;;  %s1255_s19 = smov 0  }
   0x8   :  { %s1257_s20 = smov 0   ;;  %s1259_s21 = smov 0  }
   0x9   :  { %s1261_s22 = smov 0   ;;  %s1263_s23 = smov 0  }
   0xa LB: > { %1515 = sst [smem:[#allocation11_spill]] %s1212_s22  ;;  %s914_s24 = sadd.s32 4294967295, %s1216_s23   ;;  %s1216_s23 = sphi %s1263_s23, %s24_s23   ;;  %s1212_s22 = sphi %s1261_s22, %s1524_s22   ;;  %s1208_s21 = sphi %s1259_s21, %s1523_s21   ;;  %s1204_s20 = sphi %s1257_s20, %s1527_s20   ;;  %s1200_s19 = sphi %s1255_s19, %s1526_s19   ;;  %s1196_s18 = sphi %s1253_s18, %s1525_s18  }
   0xb   : > { %s915_s25 = sadd.s32 4294967294, %s1216_s23   ;;  %s43_s26 = sadd.s32 1, %s1212_s22 }
   0xc   : > { %s52_s27 = sadd.s32 1, %s1204_s20  ;;  %p45_p0 = scmp.ge.s32.totalorder %s43_s26, 2 }
   0xd   : > { %p59_p1 = scmp.ne.s32.totalorder %s1204_s20, %s1200_s19  ;;  %p60_p2 = scmp.eq.s32.totalorder %s1216_s23, 0 }
   0xe   : > { %p65_p3 = scmp.ne.s32.totalorder %s1200_s19, %s1196_s18  ;;  %s1529_s26 = smov (%p45_p0, %s43_s26), 0 }
   0xf   : > { %1516 = sst [smem:[#allocation12_spill]] %s1529_s26  ;;  %p1294_p4 = por %p60_p2, %p59_p1 }
  0x10   : > { %p66_p5 = scmp.eq.s32.totalorder %s914_s24, 0  ;;  %s47_s29 = ssub.s32 %s1212_s22, %s1529_s26 }
  0x11   : > { %p199_p6 = scmp.eq.s32.totalorder %s914_s24, 1  ;;  %p50_p7 = scmp.eq.s32.totalorder %s47_s29, 0 }
  0x12   : > { %p1300_p8 = por %p66_p5, %p65_p3  ;;  %p205_p10 = scmp.eq.s32.totalorder %s915_s25, 1 }
  0x13   : > { %p1304_p9 = por %p199_p6, %p59_p1  ;;  %p920_p12 = scmp.ge.s32.totalorder %s1216_s23, 2 }
  0x14   : > { %s1309_s7 = scalar_select %p50_p7, %s1204_s20, %s52_s27  }
  0x15   : > { %p1311_p11 = por %p205_p10, %p65_p3  ;;  %p1012_p13 = scmp.lt.s32.totalorder %s1216_s23, 2 }
  0x16   : > { %s1318_s9 = sand.u32 1, %s1204_s20   ;;  %s984_s11 = sshll.u32 %s1212_s22, 7 }
  0x17   : > { %s921_s10 = sshll.u32 %s1318_s9, 7  ;;  %s1521_s0 = sld [smem:[#allocation13_spill]] }
  0x18   : > { %s256_s15 = scalar_lea.vmem [#allocation2], %s921_s10  ;;  %p1327_p0 = pnand %p1012_p13, %p1294_p4 }
  0x19   : > { %s266_s16 = sshll.u32 %s256_s15, 4  ;;  %p927_p1 = scmp.ge.s32.totalorder %s1216_s23, 1  ;;  %s267_s16 = int_to_ptr.vmem [resolvable:$true] %s266_s16 }
  0x1a   : > { %s253_s25 = scalar_lea.sflag [#allocation3], %s1318_s9  ;;  %s1218_s27 = smov 256  }
  0x1b   : > { %s1219_s29 = smov 16   ;;  %p298_p2 = scmp.lt.s32.totalorder %s1216_s23, 3 }
  0x1c   : > { %s280_s28 = scalar_lea.vmem [#allocation5], %s921_s10  ;;  %s277_s26 = scalar_lea.sflag [#allocation6], %s1318_s9 }
  0x1d   : > { %s263_s14 = scalar_lea.hbm %s1521_s0, %s984_s11  ;;  %p299_p3 = pnand %p927_p1, %p298_p2 }
  0x1e   : > { %s264_s17 = sshll.u32 %s263_s14, 4  ;;  %s287_s14 = scalar_lea.hbm %s1507_s1, %s984_s11  ;;  %s265_s17 = int_to_ptr.hbm [resolvable:$true] %s264_s17 }
  0x1f   : > { %1004 = dma.hbm_to_vmem [thread:$0]  (!%p1327_p0), %s265_s17, 2048, %s267_s16, %s253_s25, %s1218_s27, %s1218_s27, %s1219_s29  }
  0x20   : > { %s288_s15 = sshll.u32 %s287_s14, 4  ;;  %s290_s0 = sshll.u32 %s280_s28, 4  ;;  %s289_s15 = int_to_ptr.hbm [resolvable:$true] %s288_s15  ;;  %s291_s0 = int_to_ptr.vmem [resolvable:$true] %s290_s0 }
  0x21   : > { %1007 = dma.hbm_to_vmem [thread:$0]  (!%p1327_p0), %s289_s15, 2048, %s291_s0, %s277_s26, %s1218_s27, %s1218_s27, %s1219_s29  }
  0x22   : > { %302 = sbr.rel (%p299_p3) target bundleno = 262 (0x106), region = 40  ;;  %s1343_s22 = sand.u32 (!%p299_p3), 1, %s1200_s19  }
  0x23   : > { %s928_s16 = sshll.u32 (!%p299_p3), %s1343_s22, 7  ;;  %s305_s17 = scalar_lea.sflag (!%p299_p3), [#allocation3], %s1343_s22 }
  0x24   : > { %s1347_s25 = scalar_lea.vmem (!%p299_p3), [#allocation2], %s928_s16 }
  0x27   : > { %1183 = dma.done.wait (%p1300_p8), %s305_s17, 2048  }
  0x28   : > { %1185 = vsyncadd (%p1300_p8), %s305_s17, 4294965248  ;;  %s315_s9 = scalar_lea.sflag [#allocation6], %s1343_s22  ;;  %s1354_s0 = scalar_lea.vmem [#allocation5], %s928_s16 }
  0x29   : > { %1187 = dma.done.wait (%p1300_p8), %s315_s9, 2048  }
  0x2a   : > { %1189 = vsyncadd (%p1300_p8), %s315_s9, 4294965248  ;;  %v425_v0 = vld [vmem:[%s1354_s0 + $0x60] sm:$0xff]  ;;  %v427_v1 = vld [vmem:[%s1354_s0 + $0x70] sm:$0xff]  ;;  %v1220_v25 = vmov 0   ;;  %vm473_vm0 = vcmask 523264   ;;  %s930_s9 = sshll.u32 %s1343_s22, 6 }
  0x2b   : > { %v426_v2 = vld [vmem:[%s1354_s0 + $0x68] sm:$0xff]  ;;  %v435_v3 = vpack.c.bf16 %v427_v1, %v425_v0  ;;  %v428_v4 = vld [vmem:[%s1354_s0 + $0x78] sm:$0xff]  ;;  %v401_v5 = vld [vmem:[%s1347_s25 + $0x60] sm:$0xff]  ;;  %1067 = vset.pattern.permute.xlu0 %v1220_v25  ;;  %1068 = vset.pattern.permute.xlu1 %v1220_v25  ;;  %s994_s26 = sshll.u32 %s1208_s21, 6  ;;  %s731_s27 = scalar_lea.sflag [#allocation4], %s1343_s22 }
  0x2c   : > { %v403_v6 = vld [vmem:[%s1347_s25 + $0x70] sm:$0xff]  ;;  %v436_v7 = vpack.c.bf16 %v428_v4, %v426_v2  ;;  %v402_v9 = vld [vmem:[%s1347_s25 + $0x68] sm:$0xff]  ;;  %v404_v10 = vld [vmem:[%s1347_s25 + $0x78] sm:$0xff]  ;;  %1069 = vset.pattern.permute.xlu2 %v1220_v25  ;;  %s747_s11 = scalar_lea.hbm %s1511_s5, %s994_s26  ;;  %s1150_s15 = scalar_lea.hbm %s1511_s5, 128 }
  0x2d   : > { %v411_v8 = vpack.c.bf16 %v403_v6, %v401_v5  ;;  %v421_v11 = vld [vmem:[%s1354_s0 + $0x40] sm:$0xff]  ;;  %490 = vmatpush.bf16.msra.mxu0 %v435_v3  ;;  %v412_v12 = vpack.c.bf16 %v404_v10, %v402_v9  ;;  %v423_v13 = vld [vmem:[%s1354_s0 + $0x50] sm:$0xff]  ;;  %v422_v14 = vld [vmem:[%s1354_s0 + $0x48] sm:$0xff]  ;;  %s750_s21 = sshll.u32 %s747_s11, 4  ;;  %s751_s21 = int_to_ptr.hbm [resolvable:$true] %s750_s21 }
  0x2e   : > { %v424_v15 = vld [vmem:[%s1354_s0 + $0x58] sm:$0xff]  ;;  %519 = vmatpush.bf16.msra.mxu1 %v436_v7  ;;  %v433_v16 = vpack.c.bf16 %v423_v13, %v421_v11  ;;  %v397_v18 = vld [vmem:[%s1347_s25 + $0x40] sm:$0xff]  ;;  %v399_v19 = vld [vmem:[%s1347_s25 + $0x50] sm:$0xff]  ;;  %s1144_s29 = sshra.s32 %s751_s21, 4  ;;  %s1145_s29 = int_to_ptr.hbm [resolvable:$true] %s1144_s29 }
  0x2f   : > { %580 = vmatpush.bf16.msra.mxu2 %v411_v8  ;;  %v434_v17 = vpack.c.bf16 %v424_v15, %v422_v14  ;;  %v398_v20 = vld [vmem:[%s1347_s25 + $0x48] sm:$0xff]  ;;  %609 = vmatpush.bf16.msra.mxu3 %v412_v12  ;;  %v409_v21 = vpack.c.bf16 %v399_v19, %v397_v18  ;;  %v400_v22 = vld [vmem:[%s1347_s25 + $0x58] sm:$0xff]  ;;  %v417_v23 = vld [vmem:[%s1354_s0 + $0x20] sm:$0xff]  ;;  %s1146_s12 = scalar_lea.hbm %s1145_s29, 64  ;;  %p1151_p7 = scmp.lt.s32.totalorder %s1145_s29, %s1511_s5 }
  0x30   : > { %v419_v24 = vld [vmem:[%s1354_s0 + $0x30] sm:$0xff]  ;;  %v410_v26 = vpack.c.bf16 %v400_v22, %v398_v20  ;;  %v418_v27 = vld [vmem:[%s1354_s0 + $0x28] sm:$0xff]  ;;  %v420_v28 = vld [vmem:[%s1354_s0 + $0x38] sm:$0xff]  ;;  %p1147_p4 = scmp.ne.s32.totalorder %s1145_s29, %s1146_s12  ;;  %p1152_p8 = scmp.lt.s32.totalorder %s1150_s15, %s1146_s12 }
  0x31   : > { %v393_v29 = vld [vmem:[%s1347_s25 + $0x20] sm:$0xff]  ;;  %491 = vmatpush.bf16.msra.mxu0 %v433_v16  ;;  %v431_v30 = vpack.c.bf16 %v419_v24, %v417_v23  ;;  %v395_v31 = vld [vmem:[%s1347_s25 + $0x30] sm:$0xff]  ;;  %v394_v32 = vld [vmem:[%s1347_s25 + $0x28] sm:$0xff]  ;;  %v432_v34 = vpack.c.bf16 %v420_v28, %v418_v27 }
  0x32   : > { %v396_v33 = vld [vmem:[%s1347_s25 + $0x38] sm:$0xff]  ;;  %520 = vmatpush.bf16.msra.mxu1 %v434_v17  ;;  %v407_v35 = vpack.c.bf16 %v395_v31, %v393_v29  ;;  %v413_v36 = vld [vmem:[%s1354_s0] sm:$0xff]  ;;  %v415_v37 = vld [vmem:[%s1354_s0 + $0x10] sm:$0xff]  ;;  %p1148_p5 = pnand %p1147_p4, %p1304_p9  ;;  %p1153_p10 = por %p1152_p8, %p1151_p7 }
  0x33   : > { %581 = vmatpush.bf16.msra.mxu2 %v409_v21  ;;  %v414_v38 = vld [vmem:[%s1354_s0 + $0x8] sm:$0xff]  ;;  %610 = vmatpush.bf16.msra.mxu3 %v410_v26  ;;  %v408_v39 = vpack.c.bf16 %v396_v33, %v394_v32  ;;  %v416_v40 = vld [vmem:[%s1354_s0 + $0x18] sm:$0xff]  ;;  %v389_v41 = vld [vmem:[%s1347_s25] sm:$0xff]  ;;  %v429_v45 = vpack.c.bf16 %v415_v37, %v413_v36  ;;  %s1457_s0 = scalar_lea.vmem [#allocation7], %s930_s9 }
  0x34   : > { %v391_v42 = vld [vmem:[%s1347_s25 + $0x10] sm:$0xff]  ;;  %v390_v43 = vld [vmem:[%s1347_s25 + $0x8] sm:$0xff]  ;;  %v392_v44 = vld [vmem:[%s1347_s25 + $0x18] sm:$0xff]  ;;  %v430_v46 = vpack.c.bf16 %v416_v40, %v414_v38  ;;  %s748_s24 = sshll.u32 %s1457_s0, 4  ;;  %p1149_p6 = pneg %p1148_p5  ;;  %s749_s24 = int_to_ptr.vmem [resolvable:$true] %s748_s24 }
  0x35   : > { %492 = vmatpush.bf16.msra.mxu0 %v431_v30  ;;  %v405_v47 = vpack.c.bf16 %v391_v42, %v389_v41  ;;  %v634_v48 = vld [vmem:[%s1510_s4] sm:$0xff]  ;;  %v406_v49 = vpack.c.bf16 %v392_v44, %v390_v43  ;;  %v635_v52 = vld [vmem:[%s1510_s4 + $0x8] sm:$0xff]  ;;  %v636_v53 = vld [vmem:[%s1510_s4 + $0x10] sm:$0xff] }
  0x36   : > { %521 = vmatpush.bf16.msra.mxu1 %v432_v34  ;;  %644 = vperm.xlu0 %1067, %v634_v48   ;;  %v990_v50 = vld [vmem:[%s1509_s3] sm:$0xff]  ;;  %v637_v54 = vld [vmem:[%s1510_s4 + $0x18] sm:$0xff]  ;;  %v991_v55 = vld [vmem:[%s1509_s3 + $0x8] sm:$0xff]  ;;  %p1154_p13 = pnand %p1153_p10, %p1149_p6 }
  0x37   : > { %582 = vmatpush.bf16.msra.mxu2 %v407_v35  ;;  %611 = vmatpush.bf16.msra.mxu3 %v408_v39  ;;  %v986_v51 = vld [vmem:[%s1508_s2] sm:$0xff]  ;;  %v987_v56 = vld [vmem:[%s1508_s2 + $0x8] sm:$0xff]  ;;  %v641_v57 = vld [vmem:[%s1510_s4 + $0x38] sm:$0xff] }
  0x38   : > { %654 = vperm.xlu1 %1068, %v636_v53   ;;  %v640_v58 = vld [vmem:[%s1510_s4 + $0x30] sm:$0xff]  ;;  %v638_v59 = vld [vmem:[%s1510_s4 + $0x20] sm:$0xff]  ;;  %v639_v60 = vld [vmem:[%s1510_s4 + $0x28] sm:$0xff] }
  0x39   : > { %493 = vmatpush.bf16.msra.mxu0 %v429_v45  ;;  %664 = vperm.xlu2 %1069, %v638_v59   ;;  %v992_v61 = vld [vmem:[%s1509_s3 + $0x10] sm:$0xff]  ;;  %v993_v63 = vld [vmem:[%s1509_s3 + $0x18] sm:$0xff] }
  0x3a   : > { %522 = vmatpush.bf16.msra.mxu1 %v430_v46  ;;  %v988_v62 = vld [vmem:[%s1508_s2 + $0x10] sm:$0xff]  ;;  %v989_v0 = vld [vmem:[%s1508_s2 + $0x18] sm:$0xff] }
  0x3b   : > { %583 = vmatpush.bf16.msra.mxu2 %v405_v47  ;;  %612 = vmatpush.bf16.msra.mxu3 %v406_v49 }
  0x3c   : > { %947 = vmatmul.msk.bf16.vlgmr.msra.gmra.mxu0 %vm473_vm0, %v990_v50 }
  0x3d   : > { %951 = vmatmul.msk.bf16.vlgmr.msra.gmra.mxu1 %vm473_vm0, %v990_v50 }
  0x3e   : > { %971 = vmatmul.msk.bf16.vlgmr.msra.gmra.mxu2 %vm473_vm0, %v986_v51  ;;  %975 = vmatmul.msk.bf16.vlgmr.msra.gmra.mxu3 %vm473_vm0, %v986_v51 }
  0x3f   : > { %649 = vperm.xlu0 %1067, %v635_v52  }
  0x40   : > { %659 = vperm.xlu1 %1068, %v637_v54  }
  0x41   : > { %669 = vperm.xlu2 %1069, %v639_v60  }
  0x47   : > { %674 = vperm.xlu0 %1067, %v640_v58  }
  0x48   : > { %679 = vperm.xlu1 %1068, %v641_v57  }
  0x4c   : > { %948 = vmatmul.msk.bf16.gmra.mxu0 %vm473_vm0, %v991_v55 }
  0x4d   : > { %952 = vmatmul.msk.bf16.gmra.mxu1 %vm473_vm0, %v991_v55 }
  0x4e   : > { %972 = vmatmul.msk.bf16.gmra.mxu2 %vm473_vm0, %v987_v56  ;;  %976 = vmatmul.msk.bf16.gmra.mxu3 %vm473_vm0, %v987_v56 }
  0x5c   : > { %949 = vmatmul.msk.bf16.gmra.mxu0 %vm473_vm0, %v992_v61 }
  0x5d   : > { %953 = vmatmul.msk.bf16.gmra.mxu1 %vm473_vm0, %v992_v61 }
  0x5e   : > { %973 = vmatmul.msk.bf16.gmra.mxu2 %vm473_vm0, %v988_v62  ;;  %977 = vmatmul.msk.bf16.gmra.mxu3 %vm473_vm0, %v988_v62 }
  0x6c   : > { %950 = vmatmul.msk.bf16.gmra.mxu0 %vm473_vm0, %v993_v63 }
  0x6d   : > { %954 = vmatmul.msk.bf16.gmra.mxu1 %vm473_vm0, %v993_v63 }
  0x6e   : > { %974 = vmatmul.msk.bf16.gmra.mxu2 %vm473_vm0, %v989_v0  ;;  %978 = vmatmul.msk.bf16.gmra.mxu3 %vm473_vm0, %v989_v0 }
  0x93   : > { %v665_v50 = vpop.permute.xlu2 %664 }
  0x9b   : > { %v670_v0 = vpop.permute.xlu2 %669 }
  0xa8   : > { %v645_v3 = vpop.permute.xlu0 %644 }
  0xaa   : > { %v655_v26 = vpop.permute.xlu1 %654 }
  0xb1   : > { %v650_v16 = vpop.permute.xlu0 %649 }
  0xb2   : > { %v660_v40 = vpop.permute.xlu1 %659 }
  0xb9   : > { %v495_v1 = vpop.f32.mrf.mxu0 }
  0xba   : > { %v524_v2 = vpop.f32.mrf.mxu1 }
  0xc1   : > { %v585_v4 = vpop.f32.mrf.mxu2  ;;  %v614_v6 = vpop.f32.mrf.mxu3 }
  0xc2   : > { %v586_v5 = vadd.f32 %v585_v4, %v495_v1  ;;  %v497_v7 = vpop.f32.mrf.mxu0  ;;  %v615_v8 = vadd.f32 %v614_v6, %v524_v2  ;;  %v526_v9 = vpop.f32.mrf.mxu1 }
  0xc4   : > { %v682_v10 = vadd.f32 %v645_v3, %v586_v5  ;;  %v683_v11 = vadd.f32 %v645_v3, %v615_v8 }
  0xc6   : > { %v698_v12 = vmax.f32 %v682_v10, 0.0  ;;  %v699_v13 = vmax.f32 %v683_v11, 0.0 }
  0xc8   : > { %v714_v14 = vpack.c.bf16 %v699_v13, %v698_v12 }
  0xc9   : > { %v587_v15 = vpop.f32.mrf.mxu2  ;;  %v616_v18 = vpop.f32.mrf.mxu3 }
  0xca   : > { %v588_v17 = vadd.f32 %v587_v15, %v497_v7  ;;  %v500_v19 = vpop.f32.mrf.mxu0  ;;  %722 = vst [vmem:[%s1457_s0] sm:$0xff] %v714_v14  ;;  %v617_v20 = vadd.f32 %v616_v18, %v526_v9  ;;  %v529_v21 = vpop.f32.mrf.mxu1 }
  0xcb   : > { %v675_v14 = vpop.permute.xlu0 %674 }
  0xcc   : > { %v684_v22 = vadd.f32 %v650_v16, %v588_v17  ;;  %v685_v23 = vadd.f32 %v650_v16, %v617_v20 }
  0xce   : > { %v700_v24 = vmax.f32 %v684_v22, 0.0  ;;  %v701_v25 = vmax.f32 %v685_v23, 0.0 }
  0xd0   : > { %v715_v27 = vpack.c.bf16 %v701_v25, %v700_v24 }
  0xd1   : > { %v590_v28 = vpop.f32.mrf.mxu2  ;;  %v619_v30 = vpop.f32.mrf.mxu3 }
  0xd2   : > { %v591_v29 = vadd.f32 %v590_v28, %v500_v19  ;;  %v502_v31 = vpop.f32.mrf.mxu0  ;;  %723 = vst [vmem:[%s1457_s0 + $0x8] sm:$0xff] %v715_v27  ;;  %v620_v32 = vadd.f32 %v619_v30, %v529_v21  ;;  %v531_v33 = vpop.f32.mrf.mxu1 }
  0xd4   : > { %v686_v34 = vadd.f32 %v655_v26, %v591_v29  ;;  %v687_v35 = vadd.f32 %v655_v26, %v620_v32  ;;  %v680_v26 = vpop.permute.xlu1 %679 }
  0xd6   : > { %v702_v36 = vmax.f32 %v686_v34, 0.0  ;;  %v703_v37 = vmax.f32 %v687_v35, 0.0 }
  0xd8   : > { %v716_v38 = vpack.c.bf16 %v703_v37, %v702_v36 }
  0xd9   : > { %v592_v39 = vpop.f32.mrf.mxu2  ;;  %v621_v42 = vpop.f32.mrf.mxu3 }
  0xda   : > { %v593_v41 = vadd.f32 %v592_v39, %v502_v31  ;;  %724 = vst [vmem:[%s1457_s0 + $0x10] sm:$0xff] %v716_v38  ;;  %v622_v43 = vadd.f32 %v621_v42, %v531_v33  ;;  %v505_v44 = vpop.f32.mrf.mxu0  ;;  %v534_v46 = vpop.f32.mrf.mxu1 }
  0xdc   : > { %v688_v45 = vadd.f32 %v660_v40, %v593_v41  ;;  %v689_v47 = vadd.f32 %v660_v40, %v622_v43 }
  0xde   : > { %v704_v48 = vmax.f32 %v688_v45, 0.0  ;;  %v705_v49 = vmax.f32 %v689_v47, 0.0 }
  0xe0   : > { %v717_v51 = vpack.c.bf16 %v705_v49, %v704_v48 }
  0xe1   : > { %v595_v52 = vpop.f32.mrf.mxu2  ;;  %v624_v54 = vpop.f32.mrf.mxu3 }
  0xe2   : > { %v596_v53 = vadd.f32 %v595_v52, %v505_v44  ;;  %725 = vst [vmem:[%s1457_s0 + $0x18] sm:$0xff] %v717_v51  ;;  %v625_v55 = vadd.f32 %v624_v54, %v534_v46  ;;  %v507_v58 = vpop.f32.mrf.mxu0  ;;  %v536_v60 = vpop.f32.mrf.mxu1 }
  0xe4   : > { %v690_v56 = vadd.f32 %v665_v50, %v596_v53  ;;  %v691_v57 = vadd.f32 %v665_v50, %v625_v55 }
  0xe6   : > { %v706_v59 = vmax.f32 %v690_v56, 0.0  ;;  %v707_v61 = vmax.f32 %v691_v57, 0.0 }
  0xe8   : > { %v718_v62 = vpack.c.bf16 %v707_v61, %v706_v59 }
  0xe9   : > { %v597_v63 = vpop.f32.mrf.mxu2  ;;  %v626_v2 = vpop.f32.mrf.mxu3 }
  0xea   : > { %v598_v1 = vadd.f32 %v597_v63, %v507_v58  ;;  %726 = vst [vmem:[%s1457_s0 + $0x20] sm:$0xff] %v718_v62  ;;  %v627_v3 = vadd.f32 %v626_v2, %v536_v60  ;;  %v510_v8 = vpop.f32.mrf.mxu0  ;;  %v539_v9 = vpop.f32.mrf.mxu1 }
  0xec   : > { %v692_v4 = vadd.f32 %v670_v0, %v598_v1  ;;  %v693_v5 = vadd.f32 %v670_v0, %v627_v3 }
  0xee   : > { %v708_v6 = vmax.f32 %v692_v4, 0.0  ;;  %v709_v7 = vmax.f32 %v693_v5, 0.0 }
  0xf0   : > { %v719_v10 = vpack.c.bf16 %v709_v7, %v708_v6 }
  0xf1   : > { %v600_v11 = vpop.f32.mrf.mxu2  ;;  %v629_v13 = vpop.f32.mrf.mxu3 }
  0xf2   : > { %v601_v12 = vadd.f32 %v600_v11, %v510_v8  ;;  %727 = vst [vmem:[%s1457_s0 + $0x28] sm:$0xff] %v719_v10  ;;  %v630_v15 = vadd.f32 %v629_v13, %v539_v9  ;;  %v512_v21 = vpop.f32.mrf.mxu0  ;;  %v541_v23 = vpop.f32.mrf.mxu1 }
  0xf4   : > { %v694_v16 = vadd.f32 %v675_v14, %v601_v12  ;;  %v695_v17 = vadd.f32 %v675_v14, %v630_v15 }
  0xf6   : > { %v710_v18 = vmax.f32 %v694_v16, 0.0  ;;  %v711_v19 = vmax.f32 %v695_v17, 0.0 }
  0xf8   : > { %v720_v20 = vpack.c.bf16 %v711_v19, %v710_v18 }
  0xf9   : > { %v602_v22 = vpop.f32.mrf.mxu2  ;;  %v631_v25 = vpop.f32.mrf.mxu3 }
  0xfa   : > { %v603_v24 = vadd.f32 %v602_v22, %v512_v21  ;;  %728 = vst [vmem:[%s1457_s0 + $0x30] sm:$0xff] %v720_v20  ;;  %v632_v27 = vadd.f32 %v631_v25, %v541_v23 }
  0xfc   : > { %v696_v28 = vadd.f32 %v680_v26, %v603_v24  ;;  %v697_v29 = vadd.f32 %v680_v26, %v632_v27 }
  0xfe   : > { %v712_v30 = vmax.f32 %v696_v28, 0.0  ;;  %v713_v31 = vmax.f32 %v697_v29, 0.0 }
 0x100   : > { %v721_v32 = vpack.c.bf16 %v713_v31, %v712_v30 }
 0x102   : > { %729 = vst [vmem:[%s1457_s0 + $0x38] sm:$0xff] %v721_v32 }
 0x103   : > { %1157 = shalt.err (!%p1154_p13)
}
 0x104   : > { %s1221_s22 = smov 128   ;;  %s1222_s17 = smov 8  }
 0x105   : > { %999 = dma.vmem_to_hbm [thread:$0]  (%p1304_p9), %s749_s24, 1024, %s751_s21, %s731_s27, %s1221_s22, %s1221_s22, %s1222_s17  }
 0x106 PF: > { %s765_s25 = sand.u32 1, %s1196_s18   ;;  %p1009_p0 = pnand %p920_p12, %p1311_p11 }
 0x107   : > { %s766_s9 = scalar_lea.sflag [#allocation4], %s765_s25 }
 0x108   : > { %p1010_p1 = pneg %p1009_p0 }
 0x10a   : > { %1191 = dma.done.wait (%p1010_p1), %s766_s9, 1024  }
 0x10b   : > { %1193 = vsyncadd (%p1010_p1), %s766_s9, 4294966272  ;;  %s24_s23 = sadd.s32 1, %s1216_s23   ;;  %s1523_s21 = sld [smem:[#allocation11_spill]] }
 0x10c   : > { %p21_p2 = scmp.ge.s32.totalorder %s24_s23, 4   ;;  %s1524_s22 = sld [smem:[#allocation12_spill]] }
 0x10d   : > { %s1525_s18 = smov %s1200_s19  ;;  %s1526_s19 = smov %s1204_s20 }
 0x10e   : > { %s1527_s20 = smov %s1309_s7  ;;  %23 = sbr.rel (!%p21_p2) target bundleno = 10 (0xa), region = 107 }
 0x113   :  { %772 = vsyncpa [#allocation3], 1 }
 0x114   :  { %774 = vsyncpa [#allocation3 + $0x1], 1 }
 0x115   :  { %775 = vsyncpa [#allocation6], 1 }
 0x116   :  { %777 = vsyncpa [#allocation6 + $0x1], 1 }
 0x117   :  { %778 = vsyncpa [#allocation4], 1 }
 0x118   :  { %780 = vsyncpa [#allocation4 + $0x1], 1 }

// kernel: tpu_custom_call.1
= control target key start
LH: loop header
LB: loop body
LE: loop exit
PB: predicated region body
PF: predicated region fallthrough
CT: control target
= control target key end

     0   :  { %s1506_s0 = inlined_call_operand.hbm [shape: f32[2,64,256], index: 0, kind: input, shape index: {}]   ;;  %s1507_s1 = inlined_call_operand.hbm [shape: f32[2,64,256], index: 1, kind: input, shape index: {}]   ;;  %s1508_s2 = inlined_call_operand.vmem [shape: bf16[64,64], index: 2, kind: input, shape index: {}]   ;;  %s1509_s3 = inlined_call_operand.vmem [shape: bf16[64,64], index: 3, kind: input, shape index: {}]   ;;  %s1510_s4 = inlined_call_operand.vmem [shape: f32[64,1], index: 4, kind: input, shape index: {}]   ;;  %s1511_s5 = inlined_call_operand.hbm [shape: bf16[2,64,256], index: 5, kind: output, shape index: {}]  }
   0x1   :  { %1514 = sst [smem:[#allocation13_spill]] %s1506_s0 }
   0x2   :  { %10 = vsyncpa [#allocation3], 0 }
   0x3   :  { %12 = vsyncpa [#allocation3 + $0x1], 0 }
   0x4   :  { %13 = vsyncpa [#allocation6], 0 }
   0x5   :  { %15 = vsyncpa [#allocation6 + $0x1], 0 }
   0x6   :  { %16 = vsyncpa [#allocation4], 0 }
   0x7   :  { %18 = vsyncpa [#allocation4 + $0x1], 0  ;;  %s1253_s18 = smov 0   ;;  %s1255_s19 = smov 0  }
   0x8   :  { %s1257_s20 = smov 0   ;;  %s1259_s21 = smov 0  }
   0x9   :  { %s1261_s22 = smov 0   ;;  %s1263_s23 = smov 0  }
   0xa LB: > { %1515 = sst [smem:[#allocation11_spill]] %s1212_s22  ;;  %s914_s24 = sadd.s32 4294967295, %s1216_s23   ;;  %s1216_s23 = sphi %s1263_s23, %s24_s23   ;;  %s1212_s22 = sphi %s1261_s22, %s1524_s22   ;;  %s1208_s21 = sphi %s1259_s21, %s1523_s21   ;;  %s1204_s20 = sphi %s1257_s20, %s1527_s20   ;;  %s1200_s19 = sphi %s1255_s19, %s1526_s19   ;;  %s1196_s18 = sphi %s1253_s18, %s1525_s18  }
   0xb   : > { %s915_s25 = sadd.s32 4294967294, %s1216_s23   ;;  %s43_s26 = sadd.s32 1, %s1212_s22 }
   0xc   : > { %s52_s27 = sadd.s32 1, %s1204_s20  ;;  %p45_p0 = scmp.ge.s32.totalorder %s43_s26, 2 }
   0xd   : > { %p59_p1 = scmp.ne.s32.totalorder %s1204_s20, %s1200_s19  ;;  %p60_p2 = scmp.eq.s32.totalorder %s1216_s23, 0 }
   0xe   : > { %p65_p3 = scmp.ne.s32.totalorder %s1200_s19, %s1196_s18  ;;  %s1529_s26 = smov (%p45_p0, %s43_s26), 0 }
   0xf   : > { %1516 = sst [smem:[#allocation12_spill]] %s1529_s26  ;;  %p1294_p4 = por %p60_p2, %p59_p1 }
  0x10   : > { %p66_p5 = scmp.eq.s32.totalorder %s914_s24, 0  ;;  %s47_s29 = ssub.s32 %s1212_s22, %s1529_s26 }
  0x11   : > { %p199_p6 = scmp.eq.s32.totalorder %s914_s24, 1  ;;  %p50_p7 = scmp.eq.s32.totalorder %s47_s29, 0 }
  0x12   : > { %p1300_p8 = por %p66_p5, %p65_p3  ;;  %p205_p10 = scmp.eq.s32.totalorder %s915_s25, 1 }
  0x13   : > { %p1304_p9 = por %p199_p6, %p59_p1  ;;  %p920_p12 = scmp.ge.s32.totalorder %s1216_s23, 2 }
  0x14   : > { %s1309_s7 = scalar_select %p50_p7, %s1204_s20, %s52_s27  }
  0x15   : > { %p1311_p11 = por %p205_p10, %p65_p3  ;;  %p1012_p13 = scmp.lt.s32.totalorder %s1216_s23, 2 }
  0x16   : > { %s1318_s9 = sand.u32 1, %s1204_s20   ;;  %s984_s11 = sshll.u32 %s1212_s22, 7 }
  0x17   : > { %s921_s10 = sshll.u32 %s1318_s9, 7  ;;  %s1521_s0 = sld [smem:[#allocation13_spill]] }
  0x18   : > { %s256_s15 = scalar_lea.vmem [#allocation2], %s921_s10  ;;  %p1327_p0 = pnand %p1012_p13, %p1294_p4 }
  0x19   : > { %s266_s16 = sshll.u32 %s256_s15, 4  ;;  %p927_p1 = scmp.ge.s32.totalorder %s1216_s23, 1  ;;  %s267_s16 = int_to_ptr.vmem [resolvable:$true] %s266_s16 }
  0x1a   : > { %s253_s25 = scalar_lea.sflag [#allocation3], %s1318_s9  ;;  %s1218_s27 = smov 256  }
  0x1b   : > { %s1219_s29 = smov 16   ;;  %p298_p2 = scmp.lt.s32.totalorder %s1216_s23, 3 }
  0x1c   : > { %s280_s28 = scalar_lea.vmem [#allocation5], %s921_s10  ;;  %s277_s26 = scalar_lea.sflag [#allocation6], %s1318_s9 }
  0x1d   : > { %s263_s14 = scalar_lea.hbm %s1521_s0, %s984_s11  ;;  %p299_p3 = pnand %p927_p1, %p298_p2 }
  0x1e   : > { %s264_s17 = sshll.u32 %s263_s14, 4  ;;  %s287_s14 = scalar_lea.hbm %s1507_s1, %s984_s11  ;;  %s265_s17 = int_to_ptr.hbm [resolvable:$true] %s264_s17 }
  0x1f   : > { %1004 = dma.hbm_to_vmem [thread:$0]  (!%p1327_p0), %s265_s17, 2048, %s267_s16, %s253_s25, %s1218_s27, %s1218_s27, %s1219_s29  }
  0x20   : > { %s288_s15 = sshll.u32 %s287_s14, 4  ;;  %s290_s0 = sshll.u32 %s280_s28, 4  ;;  %s289_s15 = int_to_ptr.hbm [resolvable:$true] %s288_s15  ;;  %s291_s0 = int_to_ptr.vmem [resolvable:$true] %s290_s0 }
  0x21   : > { %1007 = dma.hbm_to_vmem [thread:$0]  (!%p1327_p0), %s289_s15, 2048, %s291_s0, %s277_s26, %s1218_s27, %s1218_s27, %s1219_s29  }
  0x22   : > { %302 = sbr.rel (%p299_p3) target bundleno = 262 (0x106), region = 40  ;;  %s1343_s22 = sand.u32 (!%p299_p3), 1, %s1200_s19  }
  0x23   : > { %s928_s16 = sshll.u32 (!%p299_p3), %s1343_s22, 7  ;;  %s305_s17 = scalar_lea.sflag (!%p299_p3), [#allocation3], %s1343_s22 }
  0x24   : > { %s1347_s25 = scalar_lea.vmem (!%p299_p3), [#allocation2], %s928_s16 }
  0x27   : > { %1183 = dma.done.wait (%p1300_p8), %s305_s17, 2048  }
  0x28   : > { %1185 = vsyncadd (%p1300_p8), %s305_s17, 4294965248  ;;  %s315_s9 = scalar_lea.sflag [#allocation6], %s1343_s22  ;;  %s1354_s0 = scalar_lea.vmem [#allocation5], %s928_s16 }
  0x29   : > { %1187 = dma.done.wait (%p1300_p8), %s315_s9, 2048  }
  0x2a   : > { %1189 = vsyncadd (%p1300_p8), %s315_s9, 4294965248  ;;  %v425_v0 = vld [vmem:[%s1354_s0 + $0x60] sm:$0xff]  ;;  %v427_v1 = vld [vmem:[%s1354_s0 + $0x70] sm:$0xff]  ;;  %v1220_v25 = vmov 0   ;;  %vm473_vm0 = vcmask 523264   ;;  %s930_s9 = sshll.u32 %s1343_s22, 6 }
  0x2b   : > { %v426_v2 = vld [vmem:[%s1354_s0 + $0x68] sm:$0xff]  ;;  %v435_v3 = vpack.c.bf16 %v427_v1, %v425_v0  ;;  %v428_v4 = vld [vmem:[%s1354_s0 + $0x78] sm:$0xff]  ;;  %v401_v5 = vld [vmem:[%s1347_s25 + $0x60] sm:$0xff]  ;;  %1067 = vset.pattern.permute.xlu0 %v1220_v25  ;;  %1068 = vset.pattern.permute.xlu1 %v1220_v25  ;;  %s994_s26 = sshll.u32 %s1208_s21, 6  ;;  %s731_s27 = scalar_lea.sflag [#allocation4], %s1343_s22 }
  0x2c   : > { %v403_v6 = vld [vmem:[%s1347_s25 + $0x70] sm:$0xff]  ;;  %v436_v7 = vpack.c.bf16 %v428_v4, %v426_v2  ;;  %v402_v9 = vld [vmem:[%s1347_s25 + $0x68] sm:$0xff]  ;;  %v404_v10 = vld [vmem:[%s1347_s25 + $0x78] sm:$0xff]  ;;  %1069 = vset.pattern.permute.xlu2 %v1220_v25  ;;  %s747_s11 = scalar_lea.hbm %s1511_s5, %s994_s26  ;;  %s1150_s15 = scalar_lea.hbm %s1511_s5, 128 }
  0x2d   : > { %v411_v8 = vpack.c.bf16 %v403_v6, %v401_v5  ;;  %v421_v11 = vld [vmem:[%s1354_s0 + $0x40] sm:$0xff]  ;;  %490 = vmatpush.bf16.msra.mxu0 %v435_v3  ;;  %v412_v12 = vpack.c.bf16 %v404_v10, %v402_v9  ;;  %v423_v13 = vld [vmem:[%s1354_s0 + $0x50] sm:$0xff]  ;;  %v422_v14 = vld [vmem:[%s1354_s0 + $0x48] sm:$0xff]  ;;  %s750_s21 = sshll.u32 %s747_s11, 4  ;;  %s751_s21 = int_to_ptr.hbm [resolvable:$true] %s750_s21 }
  0x2e   : > { %v424_v15 = vld [vmem:[%s1354_s0 + $0x58] sm:$0xff]  ;;  %519 = vmatpush.bf16.msra.mxu1 %v436_v7  ;;  %v433_v16 = vpack.c.bf16 %v423_v13, %v421_v11  ;;  %v397_v18 = vld [vmem:[%s1347_s25 + $0x40] sm:$0xff]  ;;  %v399_v19 = vld [vmem:[%s1347_s25 + $0x50] sm:$0xff]  ;;  %s1144_s29 = sshra.s32 %s751_s21, 4  ;;  %s1145_s29 = int_to_ptr.hbm [resolvable:$true] %s1144_s29 }
  0x2f   : > { %580 = vmatpush.bf16.msra.mxu2 %v411_v8  ;;  %v434_v17 = vpack.c.bf16 %v424_v15, %v422_v14  ;;  %v398_v20 = vld [vmem:[%s1347_s25 + $0x48] sm:$0xff]  ;;  %609 = vmatpush.bf16.msra.mxu3 %v412_v12  ;;  %v409_v21 = vpack.c.bf16 %v399_v19, %v397_v18  ;;  %v400_v22 = vld [vmem:[%s1347_s25 + $0x58] sm:$0xff]  ;;  %v417_v23 = vld [vmem:[%s1354_s0 + $0x20] sm:$0xff]  ;;  %s1146_s12 = scalar_lea.hbm %s1145_s29, 64  ;;  %p1151_p7 = scmp.lt.s32.totalorder %s1145_s29, %s1511_s5 }
  0x30   : > { %v419_v24 = vld [vmem:[%s1354_s0 + $0x30] sm:$0xff]  ;;  %v410_v26 = vpack.c.bf16 %v400_v22, %v398_v20  ;;  %v418_v27 = vld [vmem:[%s1354_s0 + $0x28] sm:$0xff]  ;;  %v420_v28 = vld [vmem:[%s1354_s0 + $0x38] sm:$0xff]  ;;  %p1147_p4 = scmp.ne.s32.totalorder %s1145_s29, %s1146_s12  ;;  %p1152_p8 = scmp.lt.s32.totalorder %s1150_s15, %s1146_s12 }
  0x31   : > { %v393_v29 = vld [vmem:[%s1347_s25 + $0x20] sm:$0xff]  ;;  %491 = vmatpush.bf16.msra.mxu0 %v433_v16  ;;  %v431_v30 = vpack.c.bf16 %v419_v24, %v417_v23  ;;  %v395_v31 = vld [vmem:[%s1347_s25 + $0x30] sm:$0xff]  ;;  %v394_v32 = vld [vmem:[%s1347_s25 + $0x28] sm:$0xff]  ;;  %v432_v34 = vpack.c.bf16 %v420_v28, %v418_v27 }
  0x32   : > { %v396_v33 = vld [vmem:[%s1347_s25 + $0x38] sm:$0xff]  ;;  %520 = vmatpush.bf16.msra.mxu1 %v434_v17  ;;  %v407_v35 = vpack.c.bf16 %v395_v31, %v393_v29  ;;  %v413_v36 = vld [vmem:[%s1354_s0] sm:$0xff]  ;;  %v415_v37 = vld [vmem:[%s1354_s0 + $0x10] sm:$0xff]  ;;  %p1148_p5 = pnand %p1147_p4, %p1304_p9  ;;  %p1153_p10 = por %p1152_p8, %p1151_p7 }
  0x33   : > { %581 = vmatpush.bf16.msra.mxu2 %v409_v21  ;;  %v414_v38 = vld [vmem:[%s1354_s0 + $0x8] sm:$0xff]  ;;  %610 = vmatpush.bf16.msra.mxu3 %v410_v26  ;;  %v408_v39 = vpack.c.bf16 %v396_v33, %v394_v32  ;;  %v416_v40 = vld [vmem:[%s1354_s0 + $0x18] sm:$0xff]  ;;  %v389_v41 = vld [vmem:[%s1347_s25] sm:$0xff]  ;;  %v429_v45 = vpack.c.bf16 %v415_v37, %v413_v36  ;;  %s1457_s0 = scalar_lea.vmem [#allocation7], %s930_s9 }
  0x34   : > { %v391_v42 = vld [vmem:[%s1347_s25 + $0x10] sm:$0xff]  ;;  %v390_v43 = vld [vmem:[%s1347_s25 + $0x8] sm:$0xff]  ;;  %v392_v44 = vld [vmem:[%s1347_s25 + $0x18] sm:$0xff]  ;;  %v430_v46 = vpack.c.bf16 %v416_v40, %v414_v38  ;;  %s748_s24 = sshll.u32 %s1457_s0, 4  ;;  %p1149_p6 = pneg %p1148_p5  ;;  %s749_s24 = int_to_ptr.vmem [resolvable:$true] %s748_s24 }
  0x35   : > { %492 = vmatpush.bf16.msra.mxu0 %v431_v30  ;;  %v405_v47 = vpack.c.bf16 %v391_v42, %v389_v41  ;;  %v634_v48 = vld [vmem:[%s1510_s4] sm:$0xff]  ;;  %v406_v49 = vpack.c.bf16 %v392_v44, %v390_v43  ;;  %v635_v52 = vld [vmem:[%s1510_s4 + $0x8] sm:$0xff]  ;;  %v636_v53 = vld [vmem:[%s1510_s4 + $0x10] sm:$0xff] }
  0x36   : > { %521 = vmatpush.bf16.msra.mxu1 %v432_v34  ;;  %644 = vperm.xlu0 %1067, %v634_v48   ;;  %v990_v50 = vld [vmem:[%s1509_s3] sm:$0xff]  ;;  %v637_v54 = vld [vmem:[%s1510_s4 + $0x18] sm:$0xff]  ;;  %v991_v55 = vld [vmem:[%s1509_s3 + $0x8] sm:$0xff]  ;;  %p1154_p13 = pnand %p1153_p10, %p1149_p6 }
  0x37   : > { %582 = vmatpush.bf16.msra.mxu2 %v407_v35  ;;  %611 = vmatpush.bf16.msra.mxu3 %v408_v39  ;;  %v986_v51 = vld [vmem:[%s1508_s2] sm:$0xff]  ;;  %v987_v56 = vld [vmem:[%s1508_s2 + $0x8] sm:$0xff]  ;;  %v641_v57 = vld [vmem:[%s1510_s4 + $0x38] sm:$0xff] }
  0x38   : > { %654 = vperm.xlu1 %1068, %v636_v53   ;;  %v640_v58 = vld [vmem:[%s1510_s4 + $0x30] sm:$0xff]  ;;  %v638_v59 = vld [vmem:[%s1510_s4 + $0x20] sm:$0xff]  ;;  %v639_v60 = vld [vmem:[%s1510_s4 + $0x28] sm:$0xff] }
  0x39   : > { %493 = vmatpush.bf16.msra.mxu0 %v429_v45  ;;  %664 = vperm.xlu2 %1069, %v638_v59   ;;  %v992_v61 = vld [vmem:[%s1509_s3 + $0x10] sm:$0xff]  ;;  %v993_v63 = vld [vmem:[%s1509_s3 + $0x18] sm:$0xff] }
  0x3a   : > { %522 = vmatpush.bf16.msra.mxu1 %v430_v46  ;;  %v988_v62 = vld [vmem:[%s1508_s2 + $0x10] sm:$0xff]  ;;  %v989_v0 = vld [vmem:[%s1508_s2 + $0x18] sm:$0xff] }
  0x3b   : > { %583 = vmatpush.bf16.msra.mxu2 %v405_v47  ;;  %612 = vmatpush.bf16.msra.mxu3 %v406_v49 }
  0x3c   : > { %947 = vmatmul.msk.bf16.vlgmr.msra.gmra.mxu0 %vm473_vm0, %v990_v50 }
  0x3d   : > { %951 = vmatmul.msk.bf16.vlgmr.msra.gmra.mxu1 %vm473_vm0, %v990_v50 }
  0x3e   : > { %971 = vmatmul.msk.bf16.vlgmr.msra.gmra.mxu2 %vm473_vm0, %v986_v51  ;;  %975 = vmatmul.msk.bf16.vlgmr.msra.gmra.mxu3 %vm473_vm0, %v986_v51 }
  0x3f   : > { %649 = vperm.xlu0 %1067, %v635_v52  }
  0x40   : > { %659 = vperm.xlu1 %1068, %v637_v54  }
  0x41   : > { %669 = vperm.xlu2 %1069, %v639_v60  }
  0x47   : > { %674 = vperm.xlu0 %1067, %v640_v58  }
  0x48   : > { %679 = vperm.xlu1 %1068, %v641_v57  }
  0x4c   : > { %948 = vmatmul.msk.bf16.gmra.mxu0 %vm473_vm0, %v991_v55 }
  0x4d   : > { %952 = vmatmul.msk.bf16.gmra.mxu1 %vm473_vm0, %v991_v55 }
  0x4e   : > { %972 = vmatmul.msk.bf16.gmra.mxu2 %vm473_vm0, %v987_v56  ;;  %976 = vmatmul.msk.bf16.gmra.mxu3 %vm473_vm0, %v987_v56 }
  0x5c   : > { %949 = vmatmul.msk.bf16.gmra.mxu0 %vm473_vm0, %v992_v61 }
  0x5d   : > { %953 = vmatmul.msk.bf16.gmra.mxu1 %vm473_vm0, %v992_v61 }
  0x5e   : > { %973 = vmatmul.msk.bf16.gmra.mxu2 %vm473_vm0, %v988_v62  ;;  %977 = vmatmul.msk.bf16.gmra.mxu3 %vm473_vm0, %v988_v62 }
  0x6c   : > { %950 = vmatmul.msk.bf16.gmra.mxu0 %vm473_vm0, %v993_v63 }
  0x6d   : > { %954 = vmatmul.msk.bf16.gmra.mxu1 %vm473_vm0, %v993_v63 }
  0x6e   : > { %974 = vmatmul.msk.bf16.gmra.mxu2 %vm473_vm0, %v989_v0  ;;  %978 = vmatmul.msk.bf16.gmra.mxu3 %vm473_vm0, %v989_v0 }
  0x93   : > { %v665_v50 = vpop.permute.xlu2 %664 }
  0x9b   : > { %v670_v0 = vpop.permute.xlu2 %669 }
  0xa8   : > { %v645_v3 = vpop.permute.xlu0 %644 }
  0xaa   : > { %v655_v26 = vpop.permute.xlu1 %654 }
  0xb1   : > { %v650_v16 = vpop.permute.xlu0 %649 }
  0xb2   : > { %v660_v40 = vpop.permute.xlu1 %659 }
  0xb9   : > { %v495_v1 = vpop.f32.mrf.mxu0 }
  0xba   : > { %v524_v2 = vpop.f32.mrf.mxu1 }
  0xc1   : > { %v585_v4 = vpop.f32.mrf.mxu2  ;;  %v614_v6 = vpop.f32.mrf.mxu3 }
  0xc2   : > { %v586_v5 = vadd.f32 %v585_v4, %v495_v1  ;;  %v497_v7 = vpop.f32.mrf.mxu0  ;;  %v615_v8 = vadd.f32 %v614_v6, %v524_v2  ;;  %v526_v9 = vpop.f32.mrf.mxu1 }
  0xc4   : > { %v682_v10 = vadd.f32 %v645_v3, %v586_v5  ;;  %v683_v11 = vadd.f32 %v645_v3, %v615_v8 }
  0xc6   : > { %v698_v12 = vmax.f32 %v682_v10, 0.0  ;;  %v699_v13 = vmax.f32 %v683_v11, 0.0 }
  0xc8   : > { %v714_v14 = vpack.c.bf16 %v699_v13, %v698_v12 }
  0xc9   : > { %v587_v15 = vpop.f32.mrf.mxu2  ;;  %v616_v18 = vpop.f32.mrf.mxu3 }
  0xca   : > { %v588_v17 = vadd.f32 %v587_v15, %v497_v7  ;;  %v500_v19 = vpop.f32.mrf.mxu0  ;;  %722 = vst [vmem:[%s1457_s0] sm:$0xff] %v714_v14  ;;  %v617_v20 = vadd.f32 %v616_v18, %v526_v9  ;;  %v529_v21 = vpop.f32.mrf.mxu1 }
  0xcb   : > { %v675_v14 = vpop.permute.xlu0 %674 }
  0xcc   : > { %v684_v22 = vadd.f32 %v650_v16, %v588_v17  ;;  %v685_v23 = vadd.f32 %v650_v16, %v617_v20 }
  0xce   : > { %v700_v24 = vmax.f32 %v684_v22, 0.0  ;;  %v701_v25 = vmax.f32 %v685_v23, 0.0 }
  0xd0   : > { %v715_v27 = vpack.c.bf16 %v701_v25, %v700_v24 }
  0xd1   : > { %v590_v28 = vpop.f32.mrf.mxu2  ;;  %v619_v30 = vpop.f32.mrf.mxu3 }
  0xd2   : > { %v591_v29 = vadd.f32 %v590_v28, %v500_v19  ;;  %v502_v31 = vpop.f32.mrf.mxu0  ;;  %723 = vst [vmem:[%s1457_s0 + $0x8] sm:$0xff] %v715_v27  ;;  %v620_v32 = vadd.f32 %v619_v30, %v529_v21  ;;  %v531_v33 = vpop.f32.mrf.mxu1 }
  0xd4   : > { %v686_v34 = vadd.f32 %v655_v26, %v591_v29  ;;  %v687_v35 = vadd.f32 %v655_v26, %v620_v32  ;;  %v680_v26 = vpop.permute.xlu1 %679 }
  0xd6   : > { %v702_v36 = vmax.f32 %v686_v34, 0.0  ;;  %v703_v37 = vmax.f32 %v687_v35, 0.0 }
  0xd8   : > { %v716_v38 = vpack.c.bf16 %v703_v37, %v702_v36 }
  0xd9   : > { %v592_v39 = vpop.f32.mrf.mxu2  ;;  %v621_v42 = vpop.f32.mrf.mxu3 }
  0xda   : > { %v593_v41 = vadd.f32 %v592_v39, %v502_v31  ;;  %724 = vst [vmem:[%s1457_s0 + $0x10] sm:$0xff] %v716_v38  ;;  %v622_v43 = vadd.f32 %v621_v42, %v531_v33  ;;  %v505_v44 = vpop.f32.mrf.mxu0  ;;  %v534_v46 = vpop.f32.mrf.mxu1 }
  0xdc   : > { %v688_v45 = vadd.f32 %v660_v40, %v593_v41  ;;  %v689_v47 = vadd.f32 %v660_v40, %v622_v43 }
  0xde   : > { %v704_v48 = vmax.f32 %v688_v45, 0.0  ;;  %v705_v49 = vmax.f32 %v689_v47, 0.0 }
  0xe0   : > { %v717_v51 = vpack.c.bf16 %v705_v49, %v704_v48 }
  0xe1   : > { %v595_v52 = vpop.f32.mrf.mxu2  ;;  %v624_v54 = vpop.f32.mrf.mxu3 }
  0xe2   : > { %v596_v53 = vadd.f32 %v595_v52, %v505_v44  ;;  %725 = vst [vmem:[%s1457_s0 + $0x18] sm:$0xff] %v717_v51  ;;  %v625_v55 = vadd.f32 %v624_v54, %v534_v46  ;;  %v507_v58 = vpop.f32.mrf.mxu0  ;;  %v536_v60 = vpop.f32.mrf.mxu1 }
  0xe4   : > { %v690_v56 = vadd.f32 %v665_v50, %v596_v53  ;;  %v691_v57 = vadd.f32 %v665_v50, %v625_v55 }
  0xe6   : > { %v706_v59 = vmax.f32 %v690_v56, 0.0  ;;  %v707_v61 = vmax.f32 %v691_v57, 0.0 }
  0xe8   : > { %v718_v62 = vpack.c.bf16 %v707_v61, %v706_v59 }
  0xe9   : > { %v597_v63 = vpop.f32.mrf.mxu2  ;;  %v626_v2 = vpop.f32.mrf.mxu3 }
  0xea   : > { %v598_v1 = vadd.f32 %v597_v63, %v507_v58  ;;  %726 = vst [vmem:[%s1457_s0 + $0x20] sm:$0xff] %v718_v62  ;;  %v627_v3 = vadd.f32 %v626_v2, %v536_v60  ;;  %v510_v8 = vpop.f32.mrf.mxu0  ;;  %v539_v9 = vpop.f32.mrf.mxu1 }
  0xec   : > { %v692_v4 = vadd.f32 %v670_v0, %v598_v1  ;;  %v693_v5 = vadd.f32 %v670_v0, %v627_v3 }
  0xee   : > { %v708_v6 = vmax.f32 %v692_v4, 0.0  ;;  %v709_v7 = vmax.f32 %v693_v5, 0.0 }
  0xf0   : > { %v719_v10 = vpack.c.bf16 %v709_v7, %v708_v6 }
  0xf1   : > { %v600_v11 = vpop.f32.mrf.mxu2  ;;  %v629_v13 = vpop.f32.mrf.mxu3 }
  0xf2   : > { %v601_v12 = vadd.f32 %v600_v11, %v510_v8  ;;  %727 = vst [vmem:[%s1457_s0 + $0x28] sm:$0xff] %v719_v10  ;;  %v630_v15 = vadd.f32 %v629_v13, %v539_v9  ;;  %v512_v21 = vpop.f32.mrf.mxu0  ;;  %v541_v23 = vpop.f32.mrf.mxu1 }
  0xf4   : > { %v694_v16 = vadd.f32 %v675_v14, %v601_v12  ;;  %v695_v17 = vadd.f32 %v675_v14, %v630_v15 }
  0xf6   : > { %v710_v18 = vmax.f32 %v694_v16, 0.0  ;;  %v711_v19 = vmax.f32 %v695_v17, 0.0 }
  0xf8   : > { %v720_v20 = vpack.c.bf16 %v711_v19, %v710_v18 }
  0xf9   : > { %v602_v22 = vpop.f32.mrf.mxu2  ;;  %v631_v25 = vpop.f32.mrf.mxu3 }
  0xfa   : > { %v603_v24 = vadd.f32 %v602_v22, %v512_v21  ;;  %728 = vst [vmem:[%s1457_s0 + $0x30] sm:$0xff] %v720_v20  ;;  %v632_v27 = vadd.f32 %v631_v25, %v541_v23 }
  0xfc   : > { %v696_v28 = vadd.f32 %v680_v26, %v603_v24  ;;  %v697_v29 = vadd.f32 %v680_v26, %v632_v27 }
  0xfe   : > { %v712_v30 = vmax.f32 %v696_v28, 0.0  ;;  %v713_v31 = vmax.f32 %v697_v29, 0.0 }
 0x100   : > { %v721_v32 = vpack.c.bf16 %v713_v31, %v712_v30 }
 0x102   : > { %729 = vst [vmem:[%s1457_s0 + $0x38] sm:$0xff] %v721_v32 }
 0x103   : > { %1157 = shalt.err (!%p1154_p13)
}
 0x104   : > { %s1221_s22 = smov 128   ;;  %s1222_s17 = smov 8  }
 0x105   : > { %999 = dma.vmem_to_hbm [thread:$0]  (%p1304_p9), %s749_s24, 1024, %s751_s21, %s731_s27, %s1221_s22, %s1221_s22, %s1222_s17  }
 0x106 PF: > { %s765_s25 = sand.u32 1, %s1196_s18   ;;  %p1009_p0 = pnand %p920_p12, %p1311_p11 }
 0x107   : > { %s766_s9 = scalar_lea.sflag [#allocation4], %s765_s25 }
 0x108   : > { %p1010_p1 = pneg %p1009_p0 }
 0x10a   : > { %1191 = dma.done.wait (%p1010_p1), %s766_s9, 1024  }
 0x10b   : > { %1193 = vsyncadd (%p1010_p1), %s766_s9, 4294966272  ;;  %s24_s23 = sadd.s32 1, %s1216_s23   ;;  %s1523_s21 = sld [smem:[#allocation11_spill]] }
 0x10c   : > { %p21_p2 = scmp.ge.s32.totalorder %s24_s23, 4   ;;  %s1524_s22 = sld [smem:[#allocation12_spill]] }
 0x10d   : > { %s1525_s18 = smov %s1200_s19  ;;  %s1526_s19 = smov %s1204_s20 }
 0x10e   : > { %s1527_s20 = smov %s1309_s7  ;;  %23 = sbr.rel (!%p21_p2) target bundleno = 10 (0xa), region = 107 }
 0x113   :  { %772 = vsyncpa [#allocation3], 1 }
 0x114   :  { %774 = vsyncpa [#allocation3 + $0x1], 1 }
 0x115   :  { %775 = vsyncpa [#allocation6], 1 }
 0x116   :  { %777 = vsyncpa [#allocation6 + $0x1], 1 }
 0x117   :  { %778 = vsyncpa [#allocation4], 1 }
 0x118   :  { %780 = vsyncpa [#allocation4 + $0x1], 1 }

</bundles_post_ra>
